<compile_context>
chip_gen: v7x
topology: tpu7x:2x2x1
jax: 0.10.0
libtpu: 0.0.40
codegen_flags: <defaults>
</compile_context>

<pallas_src>
import functools

import jax
import jax.numpy as jnp
from jax.experimental import pallas as pl
from jax.experimental.pallas import tpu as pltpu


# --------------------------------------------------------------------------
# Kernel
# --------------------------------------------------------------------------
def _mlp_kernel(x_ref, w1_ref, b1_ref, w2_ref, b2_ref, w3_ref, b3_ref, o_ref):
    mm_dtype = w1_ref.dtype  # bf16 production path or f32 checking path

    # x is stored f32 in HBM; cast to the matmul dtype on the VPU here so the
    # wrapper does not need a separate cast pass over x.
    x = x_ref[...].astype(mm_dtype)

    # fc1 + relu  (MXU matmul, f32 accumulation)
    h1 = jnp.dot(x, w1_ref[...], preferred_element_type=jnp.float32)
    h1 = jnp.maximum(h1 + b1_ref[...], 0.0)

    # fc2 + relu
    h2 = jnp.dot(h1.astype(mm_dtype), w2_ref[...],
                 preferred_element_type=jnp.float32)
    h2 = jnp.maximum(h2 + b2_ref[...], 0.0)

    # fc3 + sigmoid (logistic goes to the EUP slot; epilogue stays off the VALU)
    z = jnp.dot(h2.astype(mm_dtype), w3_ref[...],
                preferred_element_type=jnp.float32)
    z = z + b3_ref[...]
    o_ref[...] = jax.nn.sigmoid(z).astype(o_ref.dtype)


# --------------------------------------------------------------------------
# Wrapper
# --------------------------------------------------------------------------
def _round_up(n, m):
    return ((n + m - 1) // m) * m


def _default_num_splits():
    """2 grid steps on v7x (2 TensorCores / chip), 1 otherwise."""
    try:
        kind = jax.devices()[0].device_kind.lower()
    except Exception:
        return 1
    return 2 if "v7" in kind else 1


@functools.partial(jax.jit, static_argnames=("num_splits", "max_block_b"))
def _forward_jit(x, params, num_splits, max_block_b):
    B, L = x.shape

    # --- batch tiling: as few grid steps as possible, 16-row-aligned tiles ---
    num_splits = max(1, int(num_splits))
    B16 = _round_up(B, 16)
    steps = num_splits if B16 >= 16 * num_splits else 1
    block_b = _round_up(-(-B16 // steps), 16)   # ceil-div, rounded to 16
    block_b = min(block_b, max_block_b)
    B_pad = _round_up(B, block_b)

    if B_pad != B:
        x = jnp.pad(x, ((0, B_pad - B), (0, 0)))

    w1, b1 = params["w1"], params["b1"]   # (L, 2L), (1, 2L)
    w2, b2 = params["w2"], params["b2"]   # (2L, 4L), (1, 4L)
    w3, b3 = params["w3"], params["b3"]   # (4L, L), (1, L)

    grid = (B_pad // block_b,)

    def const_spec(arr):
        # Weights/biases: full-array block, index never changes, so they are
        # DMA'd once and stay resident across all grid steps.
        return pl.BlockSpec(arr.shape, lambda i: (0, 0))

    # --- VMEM budget & cost estimate (all static Python ints) ---
    w_item = jnp.dtype(w1.dtype).itemsize
    weight_bytes = (L * 2 * L + 2 * L * 4 * L + 4 * L * L) * w_item
    bias_bytes = (2 * L + 4 * L + L) * 4
    io_bytes = 2 * 2 * (block_b * L * 4)                 # x + out tiles, 2-buffered
    act_bytes = block_b * (2 * L + 4 * L + 4 * L) * 4    # live f32 intermediates
    need = 2 * weight_bytes + 2 * bias_bytes + io_bytes + act_bytes + (2 << 20)
    vmem_limit = min(max(32 << 20, int(need * 1.25)), 128 << 20)

    cost = pl.CostEstimate(
        flops=2 * B_pad * 14 * L * L,
        transcendentals=B_pad * L,
        bytes_accessed=2 * B_pad * L * 4 + weight_bytes + bias_bytes,
    )

    out = pl.pallas_call(
        _mlp_kernel,
        out_shape=jax.ShapeDtypeStruct((B_pad, L), jnp.float32),
        grid=grid,
        in_specs=[
            pl.BlockSpec((block_b, L), lambda i: (i, 0)),   # x batch tile
            const_spec(w1), const_spec(b1),
            const_spec(w2), const_spec(b2),
            const_spec(w3), const_spec(b3),
        ],
        out_specs=pl.BlockSpec((block_b, L), lambda i: (i, 0)),
        compiler_params=pltpu.CompilerParams(
            dimension_semantics=("parallel",),
            vmem_limit_bytes=vmem_limit,
        ),
        cost_estimate=cost,
    )(x, w1, b1, w2, b2, w3, b3)

    return out[:B] if B_pad != B else out


def feedforward_cusum_forward(x, params, num_splits=None, max_block_b=512):
    """x: (B, L) float32. params: output of prepare_params. Returns f32 (B, L)."""
    if num_splits is None:
        num_splits = _default_num_splits()
    return _forward_jit(x, params, num_splits=num_splits, max_block_b=max_block_b)


# --------------------------------------------------------------------------
# Parameter helpers
# --------------------------------------------------------------------------
def prepare_params(params, use_bf16=True):
    """Cast weights ONCE (outside the per-call jit). bf16 is the production
    matmul dtype on all of v5e/v6e/v7x; f32 is kept for tight checking."""
    wd = jnp.bfloat16 if use_bf16 else jnp.float32
    return {
        "w1": jnp.asarray(params["w1"], wd),
        "w2": jnp.asarray(params["w2"], wd),
        "w3": jnp.asarray(params["w3"], wd),
        "b1": jnp.asarray(params["b1"], jnp.float32).reshape(1, -1),
        "b2": jnp.asarray(params["b2"], jnp.float32).reshape(1, -1),
        "b3": jnp.asarray(params["b3"], jnp.float32).reshape(1, -1),
    }


def from_torch_linear(weight_out_in, bias_out):
    """PyTorch nn.Linear stores weight as (out, in); this kernel wants (in, out)."""
    return jnp.asarray(weight_out_in).T, jnp.asarray(bias_out).reshape(1, -1)


def init_params(key, L, zero=False):
    if zero:  # faithful to the module's zero_parameters()
        return {
            "w1": jnp.zeros((L, 2 * L), jnp.float32),
            "b1": jnp.zeros((1, 2 * L), jnp.float32),
            "w2": jnp.zeros((2 * L, 4 * L), jnp.float32),
            "b2": jnp.zeros((1, 4 * L), jnp.float32),
            "w3": jnp.zeros((4 * L, L), jnp.float32),
            "b3": jnp.zeros((1, L), jnp.float32),
        }
    k1, k2, k3, k4, k5, k6 = jax.random.split(key, 6)
    scale = lambda fan_in: 1.0 / jnp.sqrt(jnp.float32(fan_in))
    return {
        "w1": jax.random.uniform(k1, (L, 2 * L), jnp.float32, -1, 1) * scale(L),
        "b1": jax.random.uniform(k2, (1, 2 * L), jnp.float32, -1, 1) * scale(L),
        "w2": jax.random.uniform(k3, (2 * L, 4 * L), jnp.float32, -1, 1) * scale(2 * L),
        "b2": jax.random.uniform(k4, (1, 4 * L), jnp.float32, -1, 1) * scale(2 * L),
        "w3": jax.random.uniform(k5, (4 * L, L), jnp.float32, -1, 1) * scale(4 * L),
        "b3": jax.random.uniform(k6, (1, L), jnp.float32, -1, 1) * scale(4 * L),
    }


def reference_forward(x, p):
    h1 = jnp.maximum(x @ p["w1"] + p["b1"], 0.0)
    h2 = jnp.maximum(h1 @ p["w2"] + p["b2"], 0.0)
    z = h2 @ p["w3"] + p["b3"]
    return jax.nn.sigmoid(z)


# --------------------------------------------------------------------------
# Self-test
# --------------------------------------------------------------------------
if __name__ == "__main__":
    L = 128  # timeseries_length
    key = jax.random.PRNGKey(0)
    kx, kp = jax.random.split(key)
    num_splits = _default_num_splits()

    # 1) Faithful-to-module check: zero_parameters() -> output is exactly 0.5.
    x0 = jax.random.normal(kx, (16, L), dtype=jnp.float32)
    p_zero = prepare_params(init_params(kp, L, zero=True), use_bf16=True)
    y0 = jax.block_until_ready(feedforward_cusum_forward(x0, p_zero, num_splits))
    assert y0.shape == (16, L)
    assert jnp.allclose(y0, 0.5), "zero-parameter module must output 0.5 everywhere"

    # 2) Non-degenerate check, f32 matmul path (tight tolerance).
    B = 48
    x = jax.random.normal(kx, (B, L), dtype=jnp.float32)
    params = init_params(kp, L, zero=False)
    ref = reference_forward(x, params)

    out_f32 = jax.block_until_ready(
        feedforward_cusum_forward(x, prepare_params(params, use_bf16=False), num_splits))
    assert out_f32.shape == (B, L)
    err = jnp.max(jnp.abs(out_f32 - ref))
    assert err < 1e-4, f"f32 path max abs diff = {err}"

    # 3) Production bf16 path + ragged batch (exercises the pad/slice tail).
    Br = 50
    xr = jax.random.normal(kx, (Br, L), dtype=jnp.float32)
    refr = reference_forward(xr, params)
    out_bf16 = jax.block_until_ready(
        feedforward_cusum_forward(xr, prepare_params(params, use_bf16=True), num_splits))
    assert out_bf16.shape == (Br, L)
    errr = jnp.max(jnp.abs(out_bf16 - refr))
    assert errr < 2e-2, f"bf16 path max abs diff = {errr}"

    print("KERNEL_OK")
</pallas_src>

<mosaic_0001>
module attributes {stable_mosaic.version = 11 : i64} {
  func.func @_mlp_kernel(%arg0: i32, %arg1: memref<16x128xf32, #tpu.memory_space<vmem>>, %arg2: memref<128x256xbf16, #tpu.memory_space<vmem>>, %arg3: memref<1x256xf32, #tpu.memory_space<vmem>>, %arg4: memref<256x512xbf16, #tpu.memory_space<vmem>>, %arg5: memref<1x512xf32, #tpu.memory_space<vmem>>, %arg6: memref<512x128xbf16, #tpu.memory_space<vmem>>, %arg7: memref<1x128xf32, #tpu.memory_space<vmem>>, %arg8: memref<16x128xf32, #tpu.memory_space<vmem>>) attributes {dimension_semantics = [#tpu.dimension_semantics<parallel>], iteration_bounds = array<i64: 1>, scalar_prefetch = 0 : i64, scratch_operands = 0 : i64, tpu.core_type = #tpu.core_type<tc>, window_params = [{transform_indices = @transform_0, window_bounds = array<i64: 16, 128>}, {pipeline_mode = #tpu.pipeline_mode<synchronous>, transform_indices = @transform_1, window_bounds = array<i64: 128, 256>}, {pipeline_mode = #tpu.pipeline_mode<synchronous>, transform_indices = @transform_2, window_bounds = array<i64: 1, 256>}, {pipeline_mode = #tpu.pipeline_mode<synchronous>, transform_indices = @transform_3, window_bounds = array<i64: 256, 512>}, {pipeline_mode = #tpu.pipeline_mode<synchronous>, transform_indices = @transform_4, window_bounds = array<i64: 1, 512>}, {pipeline_mode = #tpu.pipeline_mode<synchronous>, transform_indices = @transform_5, window_bounds = array<i64: 512, 128>}, {pipeline_mode = #tpu.pipeline_mode<synchronous>, transform_indices = @transform_6, window_bounds = array<i64: 1, 128>}, {transform_indices = @transform_7, window_bounds = array<i64: 16, 128>}]} {
    %c0 = arith.constant 0 : index
    %c0_0 = arith.constant 0 : index
    %0 = vector.load %arg1[%c0, %c0_0] : memref<16x128xf32, #tpu.memory_space<vmem>>, vector<16x128xf32>
    %1 = arith.truncf %0 : vector<16x128xf32> to vector<16x128xbf16>
    %c0_1 = arith.constant 0 : index
    %c0_2 = arith.constant 0 : index
    %2 = vector.load %arg2[%c0_1, %c0_2] : memref<128x256xbf16, #tpu.memory_space<vmem>>, vector<128x256xbf16>
    %cst = arith.constant dense<0.000000e+00> : vector<16x256xf32>
    %3 = tpu.matmul %1, %2, %cst {dimension_numbers = #tpu.dot_dimension_numbers<[1], [0], [0], [1], [0, 0, 1, 1], [], []>} : vector<16x128xbf16>, vector<128x256xbf16>, vector<16x256xf32> -> vector<16x256xf32>
    %c0_3 = arith.constant 0 : index
    %c0_4 = arith.constant 0 : index
    %4 = vector.load %arg3[%c0_3, %c0_4] : memref<1x256xf32, #tpu.memory_space<vmem>>, vector<1x256xf32>
    %5 = vector.broadcast %4 : vector<1x256xf32> to vector<16x256xf32>
    %6 = arith.addf %3, %5 : vector<16x256xf32>
    %cst_5 = arith.constant 0.000000e+00 : f32
    %7 = vector.broadcast %cst_5 : f32 to vector<16x256xf32>
    %8 = arith.maximumf %6, %7 : vector<16x256xf32>
    %9 = arith.truncf %8 : vector<16x256xf32> to vector<16x256xbf16>
    %c0_6 = arith.constant 0 : index
    %c0_7 = arith.constant 0 : index
    %10 = vector.load %arg4[%c0_6, %c0_7] : memref<256x512xbf16, #tpu.memory_space<vmem>>, vector<256x512xbf16>
    %cst_8 = arith.constant dense<0.000000e+00> : vector<16x512xf32>
    %11 = tpu.matmul %9, %10, %cst_8 {dimension_numbers = #tpu.dot_dimension_numbers<[1], [0], [0], [1], [0, 0, 1, 1], [], []>} : vector<16x256xbf16>, vector<256x512xbf16>, vector<16x512xf32> -> vector<16x512xf32>
    %c0_9 = arith.constant 0 : index
    %c0_10 = arith.constant 0 : index
    %12 = vector.load %arg5[%c0_9, %c0_10] : memref<1x512xf32, #tpu.memory_space<vmem>>, vector<1x512xf32>
    %13 = vector.broadcast %12 : vector<1x512xf32> to vector<16x512xf32>
    %14 = arith.addf %11, %13 : vector<16x512xf32>
    %cst_11 = arith.constant 0.000000e+00 : f32
    %15 = vector.broadcast %cst_11 : f32 to vector<16x512xf32>
    %16 = arith.maximumf %14, %15 : vector<16x512xf32>
    %17 = arith.truncf %16 : vector<16x512xf32> to vector<16x512xbf16>
    %c0_12 = arith.constant 0 : index
    %c0_13 = arith.constant 0 : index
    %18 = vector.load %arg6[%c0_12, %c0_13] : memref<512x128xbf16, #tpu.memory_space<vmem>>, vector<512x128xbf16>
    %cst_14 = arith.constant dense<0.000000e+00> : vector<16x128xf32>
    %19 = tpu.matmul %17, %18, %cst_14 {dimension_numbers = #tpu.dot_dimension_numbers<[1], [0], [0], [1], [0, 0, 1, 1], [], []>} : vector<16x512xbf16>, vector<512x128xbf16>, vector<16x128xf32> -> vector<16x128xf32>
    %c0_15 = arith.constant 0 : index
    %c0_16 = arith.constant 0 : index
    %20 = vector.load %arg7[%c0_15, %c0_16] : memref<1x128xf32, #tpu.memory_space<vmem>>, vector<1x128xf32>
    %21 = vector.broadcast %20 : vector<1x128xf32> to vector<16x128xf32>
    %22 = arith.addf %19, %21 : vector<16x128xf32>
    %23 = arith.negf %22 : vector<16x128xf32>
    %24 = math.exp %23 : vector<16x128xf32>
    %cst_17 = arith.constant 1.000000e+00 : f32
    %25 = vector.broadcast %cst_17 : f32 to vector<16x128xf32>
    %26 = arith.addf %25, %24 : vector<16x128xf32>
    %27 = arith.divf %25, %26 : vector<16x128xf32>
    %c0_18 = arith.constant 0 : index
    %c0_19 = arith.constant 0 : index
    %28 = vector.load %arg8[%c0_18, %c0_19] : memref<16x128xf32, #tpu.memory_space<vmem>>, vector<16x128xf32>
    tpu.vector_store %arg8[%c0_18, %c0_19], %27 {strides = array<i32>} : memref<16x128xf32, #tpu.memory_space<vmem>>, vector<16x128xf32>,
    return
  }
  func.func @transform_0(%arg0: i32) -> (i32, i32) {
    %c0_i32 = arith.constant 0 : i32
    %c0_i32_0 = arith.constant 0 : i32
    return %arg0, %c0_i32 : i32, i32
  }
  func.func @transform_1(%arg0: i32) -> (i32, i32) {
    %c0_i32 = arith.constant 0 : i32
    %c0_i32_0 = arith.constant 0 : i32
    %c0_i32_1 = arith.constant 0 : i32
    return %c0_i32, %c0_i32_0 : i32, i32
  }
  func.func @transform_2(%arg0: i32) -> (i32, i32) {
    %c0_i32 = arith.constant 0 : i32
    %c0_i32_0 = arith.constant 0 : i32
    %c0_i32_1 = arith.constant 0 : i32
    return %c0_i32, %c0_i32_0 : i32, i32
  }
  func.func @transform_3(%arg0: i32) -> (i32, i32) {
    %c0_i32 = arith.constant 0 : i32
    %c0_i32_0 = arith.constant 0 : i32
    %c0_i32_1 = arith.constant 0 : i32
    return %c0_i32, %c0_i32_0 : i32, i32
  }
  func.func @transform_4(%arg0: i32) -> (i32, i32) {
    %c0_i32 = arith.constant 0 : i32
    %c0_i32_0 = arith.constant 0 : i32
    %c0_i32_1 = arith.constant 0 : i32
    return %c0_i32, %c0_i32_0 : i32, i32
  }
  func.func @transform_5(%arg0: i32) -> (i32, i32) {
    %c0_i32 = arith.constant 0 : i32
    %c0_i32_0 = arith.constant 0 : i32
    %c0_i32_1 = arith.constant 0 : i32
    return %c0_i32, %c0_i32_0 : i32, i32
  }
  func.func @transform_6(%arg0: i32) -> (i32, i32) {
    %c0_i32 = arith.constant 0 : i32
    %c0_i32_0 = arith.constant 0 : i32
    %c0_i32_1 = arith.constant 0 : i32
    return %c0_i32, %c0_i32_0 : i32, i32
  }
  func.func @transform_7(%arg0: i32) -> (i32, i32) {
    %c0_i32 = arith.constant 0 : i32
    %c0_i32_0 = arith.constant 0 : i32
    return %arg0, %c0_i32 : i32, i32
  }
}

</mosaic_0001>

<bundles_post_ra>
// kernel: _forward_jit.1
= control target key start
LH: loop header
LB: loop body
LE: loop exit
PB: predicated region body
PF: predicated region fallthrough
CT: control target
= control target key end

     0   :  { %12 = vsyncpa [#allocation3], 0  ;;  %s1725_s0 = inlined_call_operand.hbm [shape: f32[16,128], index: 0, kind: input, shape index: {}]   ;;  %s1726_s1 = inlined_call_operand.hbm [shape: bf16[128,256], index: 1, kind: input, shape index: {}]   ;;  %s1727_s2 = inlined_call_operand.vmem [shape: f32[1,256], index: 2, kind: input, shape index: {}]   ;;  %s1728_s3 = inlined_call_operand.hbm [shape: bf16[256,512], index: 3, kind: input, shape index: {}]   ;;  %s1729_s4 = inlined_call_operand.vmem [shape: f32[1,512], index: 4, kind: input, shape index: {}]   ;;  %s1730_s5 = inlined_call_operand.hbm [shape: bf16[512,128], index: 5, kind: input, shape index: {}]   ;;  %s1731_s6 = inlined_call_operand.vmem [shape: f32[1,128], index: 6, kind: input, shape index: {}]   ;;  %s1732_s7 = inlined_call_operand.hbm [shape: f32[16,128], index: 7, kind: output, shape index: {}]  }
   0x1   :  { %13 = vsyncpa [#allocation6], 0 }
   0x2   :  { %14 = vsyncpa [#allocation9], 0 }
   0x3   :  { %15 = vsyncpa [#allocation4], 0  ;;  %s1574_s24 = smov [#allocation5]   ;;  %s1575_s26 = smov [#allocation2]  }
   0x4   :  { %s33_s25 = sshll.u32 %s1574_s24, 4  ;;  %s21_s27 = sshll.u32 %s1575_s26, 4  ;;  %s34_s25 = int_to_ptr.vmem [resolvable:$true] %s33_s25  ;;  %s1626_s27 = int_to_ptr.vmem [resolvable:$true] %s21_s27 }
   0x5   :  { %s1456_s30 = scalar_lea.hbm %s1726_s1, 2048 }
   0x6   :  { %p1457_p0 = scmp.ne.s32.totalorder %s1726_s1, %s1456_s30  ;;  %p1460_p1 = scmp.lt.u32.totalorder %s1456_s30, %s1726_s1 }
   0x8   :  { %p1462_p2 = pnand %p1460_p1, %p1457_p0 }
   0xa   :  { %1465 = shalt.err (!%p1462_p2)
}
   0xb   :  { %s1466_s12 = scalar_lea.vmem %s34_s25, 2048  ;;  %p1471_p4 = scmp.lt.s32.totalorder %s34_s25, %s34_s25 }
   0xc   :  { %p1467_p3 = scmp.ne.s32.totalorder %s34_s25, %s1466_s12  ;;  %p1472_p5 = scmp.lt.s32.totalorder %s1466_s12, %s1466_s12 }
   0xe   :  { %p1473_p6 = por %p1472_p5, %p1471_p4 }
  0x10   :  { %p1474_p7 = pnand %p1473_p6, %p1467_p3 }
  0x12   :  { %1477 = shalt.err (!%p1474_p7)
}
  0x13   :  { %s1576_s13 = smov 128   ;;  %s1577_s14 = smov 8  }
  0x14   :  { %39 = dma.hbm_to_vmem [thread:$0]  %s1726_s1, 2048, %s34_s25, [#allocation6], %s1576_s13, %s1576_s13, %s1577_s14  }
  0x15   :  { %s1478_s19 = scalar_lea.hbm %s1725_s0, 256 }
  0x16   :  { %p1479_p8 = scmp.ne.s32.totalorder %s1725_s0, %s1478_s19  ;;  %p1482_p9 = scmp.lt.u32.totalorder %s1478_s19, %s1725_s0 }
  0x18   :  { %p1484_p10 = pnand %p1482_p9, %p1479_p8 }
  0x1a   :  { %1487 = shalt.err (!%p1484_p10)
}
  0x1b   :  { %s1488_s24 = scalar_lea.vmem %s1626_s27, 256  ;;  %p1493_p12 = scmp.lt.s32.totalorder %s1626_s27, %s1626_s27 }
  0x1c   :  { %p1489_p11 = scmp.ne.s32.totalorder %s1626_s27, %s1488_s24  ;;  %p1494_p13 = scmp.lt.s32.totalorder %s1488_s24, %s1488_s24 }
  0x1e   :  { %p1495_p0 = por %p1494_p13, %p1493_p12 }
  0x20   :  { %p1496_p1 = pnand %p1495_p0, %p1489_p11 }
  0x22   :  { %1499 = shalt.err (!%p1496_p1)
}
  0x23   :  { %27 = dma.hbm_to_vmem [thread:$0]  %s1725_s0, 256, %s1626_s27, [#allocation3], %s1576_s13, %s1576_s13, %s1577_s14  }
  0x24   :  { %s1578_s26 = smov [#allocation7]   ;;  %s1500_s8 = scalar_lea.hbm %s1728_s3, 8192 }
  0x25   :  { %s47_s28 = sshll.u32 %s1578_s26, 4  ;;  %p1501_p2 = scmp.ne.s32.totalorder %s1728_s3, %s1500_s8  ;;  %s48_s28 = int_to_ptr.vmem [resolvable:$true] %s47_s28 }
  0x26   :  { %p1504_p3 = scmp.lt.u32.totalorder %s1500_s8, %s1728_s3 }
  0x28   :  { %p1506_p4 = pnand %p1504_p3, %p1501_p2 }
  0x2a   :  { %1509 = shalt.err (!%p1506_p4)
}
  0x2b   :  { %s1510_s15 = scalar_lea.vmem %s48_s28, 8192  ;;  %p1515_p6 = scmp.lt.s32.totalorder %s48_s28, %s48_s28 }
  0x2c   :  { %p1511_p5 = scmp.ne.s32.totalorder %s48_s28, %s1510_s15  ;;  %p1516_p7 = scmp.lt.s32.totalorder %s1510_s15, %s1510_s15 }
  0x2e   :  { %p1517_p8 = por %p1516_p7, %p1515_p6 }
  0x30   :  { %p1518_p9 = pnand %p1517_p8, %p1511_p5 }
  0x32   :  { %1521 = shalt.err (!%p1518_p9)
}
  0x33   :  { %s1579_s0 = smov 256   ;;  %s1580_s27 = smov 16  }
  0x34   :  { %53 = dma.hbm_to_vmem [thread:$0]  %s1728_s3, 8192, %s48_s28, [#allocation6], %s1579_s0, %s1579_s0, %s1580_s27  }
  0x35   :  { %s1581_s18 = smov [#allocation8]   ;;  %s1522_s22 = scalar_lea.hbm %s1730_s5, 4096 }
  0x36   :  { %s61_s19 = sshll.u32 %s1581_s18, 4  ;;  %p1523_p10 = scmp.ne.s32.totalorder %s1730_s5, %s1522_s22  ;;  %s62_s19 = int_to_ptr.vmem [resolvable:$true] %s61_s19 }
  0x37   :  { %p1526_p11 = scmp.lt.u32.totalorder %s1522_s22, %s1730_s5 }
  0x39   :  { %p1528_p12 = pnand %p1526_p11, %p1523_p10 }
  0x3b   :  { %1531 = shalt.err (!%p1528_p12)
}
  0x3c   :  { %s1532_s26 = scalar_lea.vmem %s62_s19, 4096  ;;  %p1537_p0 = scmp.lt.s32.totalorder %s62_s19, %s62_s19 }
  0x3d   :  { %p1533_p13 = scmp.ne.s32.totalorder %s62_s19, %s1532_s26  ;;  %p1538_p1 = scmp.lt.s32.totalorder %s1532_s26, %s1532_s26 }
  0x3f   :  { %p1539_p2 = por %p1538_p1, %p1537_p0 }
  0x41   :  { %p1540_p3 = pnand %p1539_p2, %p1533_p13 }
  0x43   :  { %1543 = shalt.err (!%p1540_p3)
}
  0x44   :  { %s1582_s3 = smov 64   ;;  %s1583_s28 = smov 4  }
  0x45   :  { %67 = dma.hbm_to_vmem [thread:$0]  %s1730_s5, 4096, %s62_s19, [#allocation9], %s1582_s3, %s1582_s3, %s1583_s28  }
  0x46   :  { %1566 = dma.done.wait [#allocation3], 256  }
  0x47   :  { %1567 = vsyncadd [#allocation3], 4294967040 }
  0x48   :  { %1568 = dma.done.wait [#allocation6], 10240  }
  0x49   :  { %1569 = vsyncadd [#allocation6], 4294957056 }
  0x4a   :  { %1570 = dma.done.wait [#allocation9], 4096  }
  0x4b   :  { %1571 = vsyncadd [#allocation9], 4294963200  ;;  %v1584_v0 = vmov 0   ;;  %v1296_v1 = vld [vmem:[#allocation5 + $0x4] ss:$8 sps:$4 sm:$0xff]   ;;  %v83_v26 = vld [vmem:[#allocation2] sm:$0xff] }
  0x4c   :  { %226 = vmatprep.mubr.bf16.mxu0 %v1584_v0  ;;  %v1298_v2 = vld [vmem:[#allocation5] ss:$8 sps:$4 sm:$0xff]   ;;  %194 = vmatprep.subr.bf16.mxu0 %v1296_v1  ;;  %v1299_v3 = vld [vmem:[#allocation5 + $0x14] ss:$8 sps:$4 sm:$0xff]   ;;  %v1301_v4 = vld [vmem:[#allocation5 + $0x10] ss:$8 sps:$4 sm:$0xff]  }
  0x4d   :  { %195 = vmatpush1.bf16.msra.mxu0 %v1298_v2  ;;  %v1302_v5 = vld [vmem:[#allocation5 + $0x24] ss:$8 sps:$4 sm:$0xff]   ;;  %v1304_v6 = vld [vmem:[#allocation5 + $0x20] ss:$8 sps:$4 sm:$0xff]   ;;  %v1305_v7 = vld [vmem:[#allocation5 + $0x34] ss:$8 sps:$4 sm:$0xff]  }
  0x4e   :  { %196 = vmatprep.subr.bf16.mxu0 %v1299_v3  ;;  %v1307_v8 = vld [vmem:[#allocation5 + $0x30] ss:$8 sps:$4 sm:$0xff]   ;;  %v1308_v9 = vld [vmem:[#allocation5 + $0x44] ss:$8 sps:$4 sm:$0xff]   ;;  %v1310_v13 = vld [vmem:[#allocation5 + $0x40] ss:$8 sps:$4 sm:$0xff]  }
  0x4f   :  { %v1320_v10 = vld [vmem:[#allocation7 + $0x4] ss:$16 sps:$4 sm:$0xff]   ;;  %v1325_v11 = vld [vmem:[#allocation7] ss:$16 sps:$4 sm:$0xff]   ;;  %v84_v27 = vld [vmem:[#allocation2 + $0x8] sm:$0xff] }
  0x50   :  { %649 = vmatprep.subr.bf16.mxu1 %v1320_v10  ;;  %v1326_v12 = vld [vmem:[#allocation7 + $0x24] ss:$16 sps:$4 sm:$0xff]   ;;  %v1331_v15 = vld [vmem:[#allocation7 + $0x20] ss:$16 sps:$4 sm:$0xff]   ;;  %v1324_v28 = vld [vmem:[#allocation7 + $0xc] ss:$16 sps:$4 sm:$0xff]   ;;  %v85_v31 = vpack.c.bf16 %v84_v27, %v83_v26 }
  0x51   :  { %197 = vmatpush1.bf16.msra.mxu0 %v1301_v4  ;;  %650 = vmatpush1.bf16.msra.mxu1 %v1325_v11  ;;  %v1311_v14 = vld [vmem:[#allocation5 + $0x54] ss:$8 sps:$4 sm:$0xff]   ;;  %v1313_v17 = vld [vmem:[#allocation5 + $0x50] ss:$8 sps:$4 sm:$0xff]   ;;  %v1314_v18 = vld [vmem:[#allocation5 + $0x64] ss:$8 sps:$4 sm:$0xff]  }
  0x52   :  { %198 = vmatprep.subr.bf16.mxu0 %v1302_v5  ;;  %651 = vmatprep.subr.bf16.mxu1 %v1326_v12  ;;  %v1332_v16 = vld [vmem:[#allocation7 + $0x44] ss:$16 sps:$4 sm:$0xff]   ;;  %v1337_v19 = vld [vmem:[#allocation7 + $0x40] ss:$16 sps:$4 sm:$0xff]   ;;  %v1322_v32 = vld [vmem:[#allocation7 + $0x8] ss:$16 sps:$4 sm:$0xff]  }
  0x53   :  { %v1338_v20 = vld [vmem:[#allocation7 + $0x64] ss:$16 sps:$4 sm:$0xff]   ;;  %v1316_v21 = vld [vmem:[#allocation5 + $0x60] ss:$8 sps:$4 sm:$0xff]   ;;  %v1319_v25 = vld [vmem:[#allocation5 + $0x70] ss:$8 sps:$4 sm:$0xff]  }
  0x54   :  { %v1343_v22 = vld [vmem:[#allocation7 + $0x60] ss:$16 sps:$4 sm:$0xff]   ;;  %v1317_v23 = vld [vmem:[#allocation5 + $0x74] ss:$8 sps:$4 sm:$0xff]   ;;  %v1328_v36 = vld [vmem:[#allocation7 + $0x28] ss:$16 sps:$4 sm:$0xff]  }
  0x55   :  { %199 = vmatpush1.bf16.msra.mxu0 %v1304_v6  ;;  %652 = vmatpush1.bf16.msra.mxu1 %v1331_v15  ;;  %v1344_v24 = vld [vmem:[#allocation7 + $0x84] ss:$16 sps:$4 sm:$0xff]   ;;  %v1349_v29 = vld [vmem:[#allocation7 + $0x80] ss:$16 sps:$4 sm:$0xff]   ;;  %v1330_v34 = vld [vmem:[#allocation7 + $0x2c] ss:$16 sps:$4 sm:$0xff]  }
  0x56   :  { %200 = vmatprep.subr.bf16.mxu0 %v1305_v7  ;;  %653 = vmatprep.subr.bf16.mxu1 %v1332_v16  ;;  %v1350_v30 = vld [vmem:[#allocation7 + $0xa4] ss:$16 sps:$4 sm:$0xff]   ;;  %v1355_v33 = vld [vmem:[#allocation7 + $0xa0] ss:$16 sps:$4 sm:$0xff]   ;;  %v1336_v37 = vld [vmem:[#allocation7 + $0x4c] ss:$16 sps:$4 sm:$0xff]  }
  0x57   :  { %v1356_v35 = vld [vmem:[#allocation7 + $0xc4] ss:$16 sps:$4 sm:$0xff]   ;;  %v1361_v38 = vld [vmem:[#allocation7 + $0xc0] ss:$16 sps:$4 sm:$0xff]   ;;  %v1334_v40 = vld [vmem:[#allocation7 + $0x48] ss:$16 sps:$4 sm:$0xff]  }
  0x58   :  { %v1362_v39 = vld [vmem:[#allocation7 + $0xe4] ss:$16 sps:$4 sm:$0xff]   ;;  %v1367_v41 = vld [vmem:[#allocation7 + $0xe0] ss:$16 sps:$4 sm:$0xff]   ;;  %v1342_v42 = vld [vmem:[#allocation7 + $0x6c] ss:$16 sps:$4 sm:$0xff]  }
  0x59   :  { %201 = vmatpush1.bf16.msra.mxu0 %v1307_v8  ;;  %654 = vmatpush1.bf16.msra.mxu1 %v1337_v19  ;;  %v1368_v43 = vld [vmem:[#allocation7 + $0x104] ss:$16 sps:$4 sm:$0xff]   ;;  %v1340_v44 = vld [vmem:[#allocation7 + $0x68] ss:$16 sps:$4 sm:$0xff]   ;;  %v1348_v45 = vld [vmem:[#allocation7 + $0x8c] ss:$16 sps:$4 sm:$0xff]  }
  0x5a   :  { %202 = vmatprep.subr.bf16.mxu0 %v1308_v9  ;;  %655 = vmatprep.subr.bf16.mxu1 %v1338_v20  ;;  %v1373_v46 = vld [vmem:[#allocation7 + $0x100] ss:$16 sps:$4 sm:$0xff]   ;;  %v1374_v47 = vld [vmem:[#allocation7 + $0x124] ss:$16 sps:$4 sm:$0xff]   ;;  %v1346_v48 = vld [vmem:[#allocation7 + $0x88] ss:$16 sps:$4 sm:$0xff]  }
  0x5b   :  { %v1379_v49 = vld [vmem:[#allocation7 + $0x120] ss:$16 sps:$4 sm:$0xff]   ;;  %v1354_v50 = vld [vmem:[#allocation7 + $0xac] ss:$16 sps:$4 sm:$0xff]   ;;  %v1380_v51 = vld [vmem:[#allocation7 + $0x144] ss:$16 sps:$4 sm:$0xff]  }
  0x5c   :  { %v1352_v52 = vld [vmem:[#allocation7 + $0xa8] ss:$16 sps:$4 sm:$0xff]   ;;  %v1385_v53 = vld [vmem:[#allocation7 + $0x140] ss:$16 sps:$4 sm:$0xff]   ;;  %v1360_v54 = vld [vmem:[#allocation7 + $0xcc] ss:$16 sps:$4 sm:$0xff]  }
  0x5d   :  { %203 = vmatpush1.bf16.msra.mxu0 %v1310_v13  ;;  %656 = vmatpush1.bf16.msra.mxu1 %v1343_v22  ;;  %v1386_v55 = vld [vmem:[#allocation7 + $0x164] ss:$16 sps:$4 sm:$0xff]   ;;  %v1358_v56 = vld [vmem:[#allocation7 + $0xc8] ss:$16 sps:$4 sm:$0xff]   ;;  %v1391_v57 = vld [vmem:[#allocation7 + $0x160] ss:$16 sps:$4 sm:$0xff]   ;;  %v104_v22 = vlaneseq }
  0x5e   :  { %204 = vmatprep.subr.bf16.mxu0 %v1311_v14  ;;  %657 = vmatprep.subr.bf16.mxu1 %v1344_v24  ;;  %v1366_v58 = vld [vmem:[#allocation7 + $0xec] ss:$16 sps:$4 sm:$0xff]   ;;  %v1392_v59 = vld [vmem:[#allocation7 + $0x184] ss:$16 sps:$4 sm:$0xff]   ;;  %v1364_v60 = vld [vmem:[#allocation7 + $0xe8] ss:$16 sps:$4 sm:$0xff]  }
  0x5f   :  { %v1397_v61 = vld [vmem:[#allocation7 + $0x180] ss:$16 sps:$4 sm:$0xff]   ;;  %v1372_v62 = vld [vmem:[#allocation7 + $0x10c] ss:$16 sps:$4 sm:$0xff]   ;;  %v1398_v63 = vld [vmem:[#allocation7 + $0x1a4] ss:$16 sps:$4 sm:$0xff]  }
  0x60   :  { %v1370_v0 = vld [vmem:[#allocation7 + $0x108] ss:$16 sps:$4 sm:$0xff]   ;;  %v1378_v1 = vld [vmem:[#allocation7 + $0x12c] ss:$16 sps:$4 sm:$0xff]   ;;  %v1403_v11 = vld [vmem:[#allocation7 + $0x1a0] ss:$16 sps:$4 sm:$0xff]  }
  0x61   :  { %205 = vmatpush1.bf16.msra.mxu0 %v1313_v17  ;;  %658 = vmatpush1.bf16.msra.mxu1 %v1349_v29  ;;  %v1376_v2 = vld [vmem:[#allocation7 + $0x128] ss:$16 sps:$4 sm:$0xff]   ;;  %v1384_v3 = vld [vmem:[#allocation7 + $0x14c] ss:$16 sps:$4 sm:$0xff]   ;;  %v1404_v12 = vld [vmem:[#allocation7 + $0x1c4] ss:$16 sps:$4 sm:$0xff]  }
  0x62   :  { %206 = vmatprep.subr.bf16.mxu0 %v1314_v18  ;;  %659 = vmatprep.subr.bf16.mxu1 %v1350_v30  ;;  %v1382_v4 = vld [vmem:[#allocation7 + $0x148] ss:$16 sps:$4 sm:$0xff]   ;;  %v1390_v5 = vld [vmem:[#allocation7 + $0x16c] ss:$16 sps:$4 sm:$0xff]   ;;  %v1409_v15 = vld [vmem:[#allocation7 + $0x1c0] ss:$16 sps:$4 sm:$0xff]  }
  0x63   :  { %v1388_v6 = vld [vmem:[#allocation7 + $0x168] ss:$16 sps:$4 sm:$0xff]   ;;  %v1396_v7 = vld [vmem:[#allocation7 + $0x18c] ss:$16 sps:$4 sm:$0xff]   ;;  %v1410_v16 = vld [vmem:[#allocation7 + $0x1e4] ss:$16 sps:$4 sm:$0xff]  }
  0x64   :  { %v1394_v8 = vld [vmem:[#allocation7 + $0x188] ss:$16 sps:$4 sm:$0xff]   ;;  %v1402_v9 = vld [vmem:[#allocation7 + $0x1ac] ss:$16 sps:$4 sm:$0xff]   ;;  %v1415_v19 = vld [vmem:[#allocation7 + $0x1e0] ss:$16 sps:$4 sm:$0xff]  }
  0x65   :  { %207 = vmatpush1.bf16.msra.mxu0 %v1316_v21  ;;  %660 = vmatpush1.bf16.msra.mxu1 %v1355_v33  ;;  %v1400_v10 = vld [vmem:[#allocation7 + $0x1a8] ss:$16 sps:$4 sm:$0xff]   ;;  %v1408_v13 = vld [vmem:[#allocation7 + $0x1cc] ss:$16 sps:$4 sm:$0xff]   ;;  %v1416_v20 = vld [vmem:[#allocation8 + $0x40] sm:$0xff]  }
  0x66   :  { %208 = vmatprep.subr.bf16.mxu0 %v1317_v23  ;;  %661 = vmatprep.subr.bf16.mxu1 %v1356_v35  ;;  %v1406_v14 = vld [vmem:[#allocation7 + $0x1c8] ss:$16 sps:$4 sm:$0xff]   ;;  %v1414_v17 = vld [vmem:[#allocation7 + $0x1ec] ss:$16 sps:$4 sm:$0xff]   ;;  %v1417_v21 = vld [vmem:[#allocation8 + $0xc0] sm:$0xff]   ;;  %v1687_v23 = vshrl.u32 %v104_v22, 7 }
  0x67   :  { %v1412_v18 = vld [vmem:[#allocation7 + $0x1e8] ss:$16 sps:$4 sm:$0xff]  }
  0x68   :  { %v106_v24 = vsub.s32 0, %v1687_v23  ;;  %v110_v26 = vsub.s32 1, %v1687_v23 }
  0x69   :  { %209 = vmatpush1.bf16.msra.mxu0 %v1319_v25  ;;  %662 = vmatpush1.bf16.msra.mxu1 %v1361_v38  ;;  %v102_v25 = vld [vmem:[%s1727_s2] sm:$0x3] }
  0x6a   :  { %692 = vmatprep.subr.bf16.mxu0 %v1324_v28  ;;  %663 = vmatprep.subr.bf16.mxu1 %v1362_v39  ;;  %v107_v27 = vrot.slane %v102_v25, %v106_v24  ;;  %v111_v28 = vrot.slane %v102_v25, %v110_v26 }
  0x6c   :  { %227 = vmatmul.mubr.bf16.vlgmr.msra.gmra.mrb[0].mxu0 %v85_v31 }
  0x6d   :  { %693 = vmatpush1.bf16.msra.mxu0 %v1322_v32  ;;  %664 = vmatpush1.bf16.msra.mxu1 %v1367_v41 }
  0x6e   :  { %694 = vmatprep.subr.bf16.mxu0 %v1330_v34  ;;  %665 = vmatprep.subr.bf16.mxu1 %v1368_v43  ;;  %v1418_v43 = vld [vmem:[#allocation8] sm:$0xff]  }
  0x71   :  { %695 = vmatpush1.bf16.msra.mxu0 %v1328_v36  ;;  %666 = vmatpush1.bf16.msra.mxu1 %v1373_v46  ;;  %v1421_v46 = vld [vmem:[#allocation8 + $0xc8] sm:$0xff]  }
  0x72   :  { %696 = vmatprep.subr.bf16.mxu0 %v1336_v37  ;;  %667 = vmatprep.subr.bf16.mxu1 %v1374_v47  ;;  %v1422_v47 = vld [vmem:[#allocation8 + $0x8] sm:$0xff]  }
  0x75   :  { %697 = vmatpush1.bf16.msra.mxu0 %v1334_v40  ;;  %668 = vmatpush1.bf16.msra.mxu1 %v1379_v49  ;;  %v1424_v49 = vld [vmem:[#allocation8 + $0x50] sm:$0xff]  }
  0x76   :  { %698 = vmatprep.subr.bf16.mxu0 %v1342_v42  ;;  %669 = vmatprep.subr.bf16.mxu1 %v1380_v51  ;;  %v1426_v51 = vld [vmem:[#allocation8 + $0x10] sm:$0xff]  }
  0x79   :  { %699 = vmatpush1.bf16.msra.mxu0 %v1340_v44  ;;  %670 = vmatpush1.bf16.msra.mxu1 %v1385_v53  ;;  %v1419_v44 = vld [vmem:[#allocation8 + $0x80] sm:$0xff]   ;;  %v1428_v53 = vld [vmem:[#allocation8 + $0x58] sm:$0xff]  }
  0x7a   :  { %700 = vmatprep.subr.bf16.mxu0 %v1348_v45  ;;  %671 = vmatprep.subr.bf16.mxu1 %v1386_v55  ;;  %v1420_v45 = vld [vmem:[#allocation8 + $0x48] sm:$0xff]   ;;  %v1430_v55 = vld [vmem:[#allocation8 + $0x18] sm:$0xff]  }
  0x7d   :  { %701 = vmatpush1.bf16.msra.mxu0 %v1346_v48  ;;  %672 = vmatpush1.bf16.msra.mxu1 %v1391_v57  ;;  %v1423_v48 = vld [vmem:[#allocation8 + $0x88] sm:$0xff]   ;;  %v1432_v57 = vld [vmem:[#allocation8 + $0x60] sm:$0xff]  }
  0x7e   :  { %702 = vmatprep.subr.bf16.mxu0 %v1354_v50  ;;  %673 = vmatprep.subr.bf16.mxu1 %v1392_v59  ;;  %v1425_v50 = vld [vmem:[#allocation8 + $0xd0] sm:$0xff]   ;;  %v1434_v59 = vld [vmem:[#allocation8 + $0x20] sm:$0xff]  }
  0x81   :  { %703 = vmatpush1.bf16.msra.mxu0 %v1352_v52  ;;  %674 = vmatpush1.bf16.msra.mxu1 %v1397_v61  ;;  %v1427_v52 = vld [vmem:[#allocation8 + $0x90] sm:$0xff]   ;;  %v1436_v61 = vld [vmem:[#allocation8 + $0x68] sm:$0xff]  }
  0x82   :  { %704 = vmatprep.subr.bf16.mxu0 %v1360_v54  ;;  %675 = vmatprep.subr.bf16.mxu1 %v1398_v63  ;;  %v1429_v54 = vld [vmem:[#allocation8 + $0xd8] sm:$0xff]   ;;  %v1438_v63 = vld [vmem:[#allocation8 + $0x28] sm:$0xff]  }
  0x85   :  { %705 = vmatpush1.bf16.msra.mxu0 %v1358_v56  ;;  %676 = vmatpush1.bf16.msra.mxu1 %v1403_v11  ;;  %v1431_v56 = vld [vmem:[#allocation8 + $0x98] sm:$0xff]   ;;  %v323_v11 = vsub.s32 3, %v1687_v23 }
  0x86   :  { %706 = vmatprep.subr.bf16.mxu0 %v1366_v58  ;;  %677 = vmatprep.subr.bf16.mxu1 %v1404_v12  ;;  %v1433_v58 = vld [vmem:[#allocation8 + $0xe0] sm:$0xff]  }
  0x89   :  { %707 = vmatpush1.bf16.msra.mxu0 %v1364_v60  ;;  %678 = vmatpush1.bf16.msra.mxu1 %v1409_v15  ;;  %v1435_v60 = vld [vmem:[#allocation8 + $0xa0] sm:$0xff]  }
  0x8a   :  { %708 = vmatprep.subr.bf16.mxu0 %v1372_v62  ;;  %679 = vmatprep.subr.bf16.mxu1 %v1410_v16  ;;  %v1437_v62 = vld [vmem:[#allocation8 + $0xe8] sm:$0xff]  }
  0x8d   :  { %709 = vmatpush1.bf16.msra.mxu0 %v1370_v0  ;;  %680 = vmatpush1.bf16.msra.mxu1 %v1415_v19  ;;  %v1439_v0 = vld [vmem:[#allocation8 + $0xa8] sm:$0xff]  }
  0x8e   :  { %710 = vmatprep.subr.bf16.mxu0 %v1378_v1  ;;  %1240 = vmatprep.subr.bf16.mxu1 %v1416_v20  ;;  %v1440_v1 = vld [vmem:[#allocation8 + $0x70] sm:$0xff]  }
  0x91   :  { %711 = vmatpush1.bf16.msra.mxu0 %v1376_v2  ;;  %v1441_v2 = vld [vmem:[#allocation8 + $0xf0] sm:$0xff]  }
  0x92   :  { %712 = vmatprep.subr.bf16.mxu0 %v1384_v3  ;;  %v1442_v3 = vld [vmem:[#allocation8 + $0x30] sm:$0xff]  }
  0x95   :  { %713 = vmatpush1.bf16.msra.mxu0 %v1382_v4  ;;  %v1443_v4 = vld [vmem:[#allocation8 + $0xb0] sm:$0xff]  }
  0x96   :  { %714 = vmatprep.subr.bf16.mxu0 %v1390_v5  ;;  %v1444_v5 = vld [vmem:[#allocation8 + $0x78] sm:$0xff]  }
  0x99   :  { %715 = vmatpush1.bf16.msra.mxu0 %v1388_v6  ;;  %v1445_v6 = vld [vmem:[#allocation8 + $0xf8] sm:$0xff]  }
  0x9a   :  { %716 = vmatprep.subr.bf16.mxu0 %v1396_v7  ;;  %v1446_v7 = vld [vmem:[#allocation8 + $0x38] sm:$0xff]  }
  0x9d   :  { %717 = vmatpush1.bf16.msra.mxu0 %v1394_v8  ;;  %v1447_v8 = vld [vmem:[#allocation8 + $0xb8] sm:$0xff]  }
  0x9e   :  { %718 = vmatprep.subr.bf16.mxu0 %v1402_v9  ;;  %v319_v9 = vsub.s32 2, %v1687_v23 }
  0xa1   :  { %719 = vmatpush1.bf16.msra.mxu0 %v1400_v10  ;;  %v307_v10 = vld [vmem:[%s1729_s4] sm:$0xf] }
  0xa2   :  { %720 = vmatprep.subr.bf16.mxu0 %v1408_v13  ;;  %v312_v12 = vrot.slane %v307_v10, %v106_v24  ;;  %v320_v13 = vrot.slane %v307_v10, %v319_v9  ;;  %v324_v15 = vrot.slane %v307_v10, %v323_v11 }
  0xa5   :  { %721 = vmatpush1.bf16.msra.mxu0 %v1406_v14  ;;  %v316_v14 = vrot.slane %v307_v10, %v110_v26 }
  0xa6   :  { %722 = vmatprep.subr.bf16.mxu0 %v1414_v17 }
  0xa9   :  { %723 = vmatpush1.bf16.msra.mxu0 %v1412_v18 }
  0xaa   :  { %1262 = vmatprep.subr.bf16.mxu0 %v1417_v21 }
 0x13f   :  { %v228_v29 = vpop.f32.mrb[0].mxu0 }
 0x140   :  { %v229_v30 = vadd.f32 %v228_v29, %v107_v27  ;;  %v230_v31 = vpop.f32.mrb[1].mxu0 }
 0x141   :  { %v231_v32 = vadd.f32 %v230_v31, %v111_v28  ;;  %v232_v33 = vpop.f32.mrb[2].mxu0 }
 0x142   :  { %v233_v34 = vadd.f32 %v232_v33, %v107_v27  ;;  %v234_v35 = vpop.f32.mrb[3].mxu0  ;;  %v237_v37 = vmax.f32 %v229_v30, 0.0 }
 0x143   :  { %v235_v36 = vadd.f32 %v234_v35, %v111_v28  ;;  %v238_v39 = vmax.f32 %v231_v32, 0.0 }
 0x144   :  { %v239_v38 = vmax.f32 %v233_v34, 0.0 }
 0x145   :  { %v240_v40 = vmax.f32 %v235_v36, 0.0 }
 0x146   :  { %v241_v41 = vpack.c.bf16 %v239_v38, %v237_v37 }
 0x147   :  { %v242_v42 = vpack.c.bf16 %v240_v40, %v238_v39 }
 0x149   :  { %681 = vmatprep.mubr.bf16.mxu1 %v242_v42  ;;  %724 = vmatprep.mubr.bf16.mxu0 %v242_v42 }
 0x14a   :  { %682 = vmatmul.mubr.bf16.vlgmr.msra.gmra.mrb[0].mxu1 %v241_v41  ;;  %725 = vmatmul.mubr.bf16.vlgmr.msra.gmra.mrb[4].mxu0 %v241_v41 }
 0x14b   :  { %1241 = vmatpush3.bf16.msra.mxu1 %v1418_v43  ;;  %1263 = vmatpush3.bf16.msra.mxu0 %v1419_v44 }
 0x14c   :  { %1242 = vmatprep.subr.bf16.mxu1 %v1420_v45  ;;  %1264 = vmatprep.subr.bf16.mxu0 %v1421_v46  ;;  %v1205_v46 = vld [vmem:[%s1731_s6] ss:$0 sm:$0xff]  ;;  %s1585_s6 = smov [#allocation10]  }
 0x14d   :  { %s1111_s11 = sshll.u32 %s1585_s6, 4  ;;  %s1112_s11 = int_to_ptr.vmem [resolvable:$true] %s1111_s11 }
 0x14e   :  { %s1544_s12 = scalar_lea.vmem %s1112_s11, 256  ;;  %p1549_p5 = scmp.lt.s32.totalorder %s1112_s11, %s1112_s11 }
 0x14f   :  { %1243 = vmatpush3.bf16.msra.mxu1 %v1422_v47  ;;  %1265 = vmatpush3.bf16.msra.mxu0 %v1423_v48  ;;  %p1545_p4 = scmp.ne.s32.totalorder %s1112_s11, %s1544_s12  ;;  %p1550_p6 = scmp.lt.s32.totalorder %s1544_s12, %s1544_s12 }
 0x150   :  { %1244 = vmatprep.subr.bf16.mxu1 %v1424_v49  ;;  %1266 = vmatprep.subr.bf16.mxu0 %v1425_v50 }
 0x151   :  { %p1551_p7 = por %p1550_p6, %p1549_p5 }
 0x153   :  { %1245 = vmatpush3.bf16.msra.mxu1 %v1426_v51  ;;  %1267 = vmatpush3.bf16.msra.mxu0 %v1427_v52  ;;  %p1552_p8 = pnand %p1551_p7, %p1545_p4 }
 0x154   :  { %1246 = vmatprep.subr.bf16.mxu1 %v1428_v53  ;;  %1268 = vmatprep.subr.bf16.mxu0 %v1429_v54 }
 0x157   :  { %1247 = vmatpush3.bf16.msra.mxu1 %v1430_v55  ;;  %1269 = vmatpush3.bf16.msra.mxu0 %v1431_v56 }
 0x158   :  { %1248 = vmatprep.subr.bf16.mxu1 %v1432_v57  ;;  %1270 = vmatprep.subr.bf16.mxu0 %v1433_v58 }
 0x15b   :  { %1249 = vmatpush3.bf16.msra.mxu1 %v1434_v59  ;;  %1271 = vmatpush3.bf16.msra.mxu0 %v1435_v60 }
 0x15c   :  { %1250 = vmatprep.subr.bf16.mxu1 %v1436_v61  ;;  %1272 = vmatprep.subr.bf16.mxu0 %v1437_v62 }
 0x15f   :  { %1251 = vmatpush3.bf16.msra.mxu1 %v1438_v63  ;;  %1273 = vmatpush3.bf16.msra.mxu0 %v1439_v0 }
 0x160   :  { %1252 = vmatprep.subr.bf16.mxu1 %v1440_v1  ;;  %1274 = vmatprep.subr.bf16.mxu0 %v1441_v2 }
 0x163   :  { %1253 = vmatpush3.bf16.msra.mxu1 %v1442_v3  ;;  %1275 = vmatpush3.bf16.msra.mxu0 %v1443_v4 }
 0x164   :  { %1254 = vmatprep.subr.bf16.mxu1 %v1444_v5  ;;  %1276 = vmatprep.subr.bf16.mxu0 %v1445_v6 }
 0x167   :  { %1255 = vmatpush3.bf16.msra.mxu1 %v1446_v7  ;;  %1277 = vmatpush3.bf16.msra.mxu0 %v1447_v8 }
 0x21d   :  { %v683_v16 = vpop.f32.mrb[0].mxu1  ;;  %v726_v17 = vpop.f32.mrb[4].mxu0 }
 0x21e   :  { %v684_v18 = vadd.f32 %v683_v16, %v312_v12  ;;  %v727_v19 = vadd.f32 %v726_v17, %v320_v13  ;;  %v685_v20 = vpop.f32.mrb[1].mxu1  ;;  %v728_v21 = vpop.f32.mrb[5].mxu0 }
 0x21f   :  { %v686_v22 = vadd.f32 %v685_v20, %v316_v14  ;;  %v729_v25 = vadd.f32 %v728_v21, %v324_v15  ;;  %v687_v27 = vpop.f32.mrb[2].mxu1  ;;  %v730_v28 = vpop.f32.mrb[6].mxu0 }
 0x220   :  { %v688_v29 = vadd.f32 %v687_v27, %v312_v12  ;;  %v731_v30 = vadd.f32 %v730_v28, %v320_v13  ;;  %v689_v31 = vpop.f32.mrb[3].mxu1  ;;  %v732_v32 = vpop.f32.mrb[7].mxu0  ;;  %v735_v34 = vmax.f32 %v684_v18, 0.0  ;;  %v737_v23 = vmax.f32 %v727_v19, 0.0 }
 0x221   :  { %v690_v24 = vadd.f32 %v689_v31, %v316_v14  ;;  %v733_v33 = vadd.f32 %v732_v32, %v324_v15  ;;  %v736_v36 = vmax.f32 %v686_v22, 0.0  ;;  %v738_v37 = vmax.f32 %v729_v25, 0.0 }
 0x222   :  { %v739_v26 = vmax.f32 %v688_v29, 0.0  ;;  %v741_v35 = vmax.f32 %v731_v30, 0.0 }
 0x223   :  { %v740_v38 = vmax.f32 %v690_v24, 0.0  ;;  %v742_v39 = vmax.f32 %v733_v33, 0.0 }
 0x224   :  { %v743_v40 = vpack.c.bf16 %v739_v26, %v735_v34  ;;  %v745_v41 = vpack.c.bf16 %v741_v35, %v737_v23 }
 0x225   :  { %v744_v42 = vpack.c.bf16 %v740_v38, %v736_v36  ;;  %v746_v43 = vpack.c.bf16 %v742_v39, %v738_v37 }
 0x227   :  { %1042 = vmatprep.mubr.bf16.mxu1 %v744_v42  ;;  %1083 = vmatprep.mubr.bf16.mxu0 %v746_v43 }
 0x228   :  { %1043 = vmatmul.mubr.bf16.vlgmr.msra.gmra.mrb[4].mxu1 %v743_v40  ;;  %1084 = vmatmul.mubr.bf16.vlgmr.msra.gmra.mrb[8].mxu0 %v745_v41 }
 0x2fb   :  { %v1256_v44 = vpop.f32.mrb[4].mxu1  ;;  %v1278_v45 = vpop.f32.mrb[8].mxu0 }
 0x2fc   :  { %v1257_v47 = vpop.f32.mrb[5].mxu1  ;;  %v1279_v48 = vpop.f32.mrb[9].mxu0 }
 0x2fd   :  { %v1258_v49 = vadd.f32 %v1257_v47, %v1256_v44  ;;  %v1280_v50 = vadd.f32 %v1279_v48, %v1278_v45  ;;  %v1259_v51 = vpop.f32.mrb[6].mxu1  ;;  %v1281_v52 = vpop.f32.mrb[10].mxu0 }
 0x2fe   :  { %v1260_v53 = vpop.f32.mrb[7].mxu1  ;;  %v1282_v54 = vpop.f32.mrb[11].mxu0 }
 0x2ff   :  { %v1045_v55 = vadd.f32 %v1258_v49, %v1205_v46  ;;  %v1261_v56 = vadd.f32 %v1260_v53, %v1259_v51  ;;  %v1283_v57 = vadd.f32 %v1282_v54, %v1281_v52 }
 0x301   :  { %v1086_v58 = vadd.f32 %v1280_v50, %v1045_v55  ;;  %v1048_v59 = vadd.f32 %v1261_v56, %v1205_v46 }
 0x303   :  { %v1238_v60 = vmul.f32 -1.442695, %v1086_v58  ;;  %v1089_v61 = vadd.f32 %v1283_v57, %v1048_v59 }
 0x305   :  { %1448 = vpow2.f32 %v1238_v60  ;;  %v1239_v62 = vmul.f32 -1.442695, %v1089_v61 }
 0x307   :  { %1450 = vpow2.f32 %v1239_v62 }
 0x30f   :  { %v1449_v63 = vpop.eup %1448 }
 0x310   :  { %v1098_v0 = vadd.f32 1.0, %v1449_v63 }
 0x311   :  { %v1451_v1 = vpop.eup %1450 }
 0x312   :  { %1452 = vrcp.f32 %v1098_v0  ;;  %v1099_v2 = vadd.f32 1.0, %v1451_v1 }
 0x314   :  { %1454 = vrcp.f32 %v1099_v2 }
 0x31c   :  { %v1453_v3 = vpop.eup %1452 }
 0x31d   :  { %1104 = vst [vmem:[#allocation10] sm:$0xff] %v1453_v3 }
 0x31e   :  { %v1455_v4 = vpop.eup %1454 }
 0x31f   :  { %1105 = vst [vmem:[#allocation10 + $0x8] sm:$0xff] %v1455_v4 }
 0x320   :  { %1555 = shalt.err (!%p1552_p8)
}
 0x321   :  { %s1556_s27 = scalar_lea.hbm %s1732_s7, 256 }
 0x322   :  { %p1557_p9 = scmp.ne.s32.totalorder %s1732_s7, %s1556_s27  ;;  %p1560_p10 = scmp.lt.u32.totalorder %s1556_s27, %s1732_s7 }
 0x324   :  { %p1562_p11 = pnand %p1560_p10, %p1557_p9 }
 0x326   :  { %1565 = shalt.err (!%p1562_p11)
}
 0x327   :  { %1117 = dma.vmem_to_hbm [thread:$0]  %s1112_s11, 256, %s1732_s7, [#allocation4], %s1576_s13, %s1576_s13, %s1577_s14  }
 0x328   :  { %1572 = dma.done.wait [#allocation4], 256  }
 0x329   :  { %1573 = vsyncadd [#allocation4], 4294967040 }
 0x32a   :  { %1121 = vsyncpa [#allocation3], 1 }
 0x32b   :  { %1122 = vsyncpa [#allocation6], 1 }
 0x32c   :  { %1123 = vsyncpa [#allocation9], 1 }
 0x32d   :  { %1124 = vsyncpa [#allocation4], 1 }

</bundles_post_ra>
